<compile_context>
chip_gen: v7x
topology: tpu7x:2x2x1
jax: 0.10.0
libtpu: 0.0.40
codegen_flags: <defaults>
</compile_context>

<pallas_src>
import dataclasses

import jax
import jax.numpy as jnp
from jax.experimental import pallas as pl
from jax.experimental.pallas import tpu as pltpu


@dataclasses.dataclass
class OutputBase:
    loss: jax.Array


def _round_up(n: int, m: int) -> int:
    return ((n + m - 1) // m) * m


def _encoder_loss_kernel(params_ref, x_ref, wsum_ref, loss_ref, acc_ref):
    """Accumulate sum(X * rowsum(W)) over all tiles; finalize scalar loss once.

    params_ref : SMEM f32[2]  -- [1/(B*hidden), mean(bias)]
    x_ref      : VMEM (tm, tk) tile of the flattened input
    wsum_ref   : VMEM (1, tk)  tile of rowsum(W)
    loss_ref   : SMEM (1, 1)   scalar output (written only at the last step)
    acc_ref    : VMEM (tm, tk) f32 resident accumulator scratch
    """
    i = pl.program_id(0)            # batch tile axis
    k = pl.program_id(1)            # feature (D) tile axis -- reduction, last

    @pl.when(jnp.logical_and(i == 0, k == 0))
    def _init():
        acc_ref[...] = jnp.zeros_like(acc_ref)

    x = x_ref[...].astype(jnp.float32)       # (tm, tk)
    w = wsum_ref[...].astype(jnp.float32)    # (1, tk), broadcast over sublanes
    # Pure VPU multiply-add into the resident accumulator; no per-step XLU
    # reduction, no per-step SMEM store.
    acc_ref[...] += x * w

    @pl.when(jnp.logical_and(i == pl.num_programs(0) - 1,
                             k == pl.num_programs(1) - 1))
    def _finalize():
        total = jnp.sum(acc_ref[...])                          # one XLU reduce
        loss_ref[0, 0] = total * params_ref[0] + params_ref[1]


class EncoderBase:
    """JAX/Pallas analogue of the PyTorch EncoderBase module."""

    def __init__(self, args):
        self.args = args
        in_dim = args["in_channels"] * args["height"] * args["width"]
        hidden = args["hidden"]
        self.in_dim = in_dim
        self.hidden = hidden

        # Deterministic parameter init (synthetic, no checkpoint load).
        kw, kb = jax.random.split(jax.random.PRNGKey(42))
        self.weight = (
            jax.random.normal(kw, (in_dim, hidden), dtype=jnp.float32) * 0.02
        )
        self.bias = jax.random.normal(kb, (1, hidden), dtype=jnp.float32) * 0.01

        # --- one-time kernel-side precomputation -----------------------------
        # mean(X@W + b) = (1/(B*H)) * dot(colsum(X), rowsum(W)) + mean(b)
        # rowsum(W): (1, D) (padded to a lane-dense multiple of tk); mean(b): scalar.
        self._tk = min(512, _round_up(in_dim, 128))     # 128-multiple lane tile
        self._d_pad = _round_up(in_dim, self._tk)
        wsum = jnp.sum(self.weight, axis=1, keepdims=True).T      # (1, D) f32
        if self._d_pad != in_dim:
            wsum = jnp.pad(wsum, ((0, 0), (0, self._d_pad - in_dim)))
        self.w_rowsum = wsum                                      # (1, D_pad)
        self.bias_mean = jnp.mean(self.bias)                      # scalar f32

    def forward(self, batch) -> OutputBase:
        x = batch["x"]                                   # (B, C, H, W), NCHW
        b = x.shape[0]
        x2d = x.reshape(b, -1)          # keep native dtype: no wrapper f32 upcast
        d = x2d.shape[1]
        assert d == self.in_dim, (d, self.in_dim)

        # Tile sizes: sublane-full batch tile (>=8), lane-dense 128-mult D tile.
        tm = 128 if b > 128 else _round_up(b, 8)
        b_pad = _round_up(b, tm)
        tk = self._tk
        d_pad = self._d_pad
        if (b_pad, d_pad) != (b, d):
            # Zero rows/columns contribute 0 to the accumulated sum.
            x2d = jnp.pad(x2d, ((0, b_pad - b), (0, d_pad - d)))

        # Scalars consumed only in the final grid step (SMEM).
        params = jnp.stack(
            [jnp.float32(1.0 / (b * self.hidden)),
             self.bias_mean.astype(jnp.float32)]
        )

        grid = (b_pad // tm, d_pad // tk)
        bytes_accessed = int(
            b_pad * d_pad * x2d.dtype.itemsize   # X streamed once
            + d_pad * 4                          # rowsum(W)
            + 2 * 4 + 4                          # params + scalar out
        )

        loss = pl.pallas_call(
            _encoder_loss_kernel,
            out_shape=jax.ShapeDtypeStruct((1, 1), jnp.float32),
            grid=grid,
            in_specs=[
                pl.BlockSpec(memory_space=pltpu.MemorySpace.SMEM),   # params
                pl.BlockSpec((tm, tk), lambda i, k: (i, k)),         # X tiles
                pl.BlockSpec((1, tk), lambda i, k: (0, k)),          # rowsum(W)
            ],
            out_specs=pl.BlockSpec(
                (1, 1), lambda i, k: (0, 0),
                memory_space=pltpu.MemorySpace.SMEM,
            ),
            scratch_shapes=[pltpu.VMEM((tm, tk), jnp.float32)],
            compiler_params=pltpu.CompilerParams(
                # The single scalar output block is resident across the whole
                # grid (accumulator pattern), so both axes must be "arbitrary".
                dimension_semantics=("arbitrary", "arbitrary"),
            ),
            cost_estimate=pl.CostEstimate(
                flops=2 * b_pad * d_pad,
                transcendentals=0,
                bytes_accessed=bytes_accessed,
            ),
        )(params, x2d, self.w_rowsum)

        return OutputBase(loss=loss[0, 0])

    __call__ = forward


if __name__ == "__main__":
    # Small shapes consistent with an NCHW encoder input.
    B, C, H, W, HIDDEN = 2, 4, 16, 16, 32
    args = {"in_channels": C, "height": H, "width": W, "hidden": HIDDEN}

    key = jax.random.PRNGKey(0)
    x = jax.random.normal(key, (B, C, H, W), dtype=jnp.float32)

    model = EncoderBase(args)
    out = model({"x": x})
    loss = jax.block_until_ready(out.loss)

    # Pure-JAX reference check of the concrete realization.
    ref = jnp.mean(x.reshape(B, -1) @ model.weight + model.bias)
    assert jnp.allclose(loss, ref, atol=1e-5, rtol=1e-4), (loss, ref)

    print("KERNEL_OK")
</pallas_src>

<mosaic_0001>
module attributes {stable_mosaic.version = 11 : i64} {
  func.func @_encoder_loss_kernel(%arg0: i32, %arg1: i32, %arg2: memref<2xf32, #tpu.memory_space<smem>>, %arg3: memref<8x512xf32, #tpu.memory_space<vmem>>, %arg4: memref<1x512xf32, #tpu.memory_space<vmem>>, %arg5: memref<1x1xf32, #tpu.memory_space<smem>>, %arg6: memref<8x512xf32, #tpu.memory_space<vmem>>) attributes {dimension_semantics = [#tpu.dimension_semantics<arbitrary>, #tpu.dimension_semantics<arbitrary>], iteration_bounds = array<i64: 1, 2>, scalar_prefetch = 0 : i64, scratch_operands = 1 : i64, tpu.core_type = #tpu.core_type<tc>, window_params = [{transform_indices = @transform_0, window_bounds = array<i64: 2>}, {transform_indices = @transform_1, window_bounds = array<i64: 8, 512>}, {transform_indices = @transform_2, window_bounds = array<i64: 1, 512>}, {transform_indices = @transform_3, window_bounds = array<i64: 1, 1>}]} {
    %c0_i32 = arith.constant 0 : i32
    %0 = arith.cmpi eq, %arg0, %c0_i32 : i32
    %c0_i32_0 = arith.constant 0 : i32
    %1 = arith.cmpi eq, %arg1, %c0_i32_0 : i32
    %2 = arith.andi %0, %1 : i1
    %3 = arith.extui %2 : i1 to i32
    %c0_i32_1 = arith.constant 0 : i32
    %4 = arith.cmpi ne, %3, %c0_i32_1 : i32
    scf.if %4 {
      %cst = arith.constant 0.000000e+00 : f32
      %17 = vector.broadcast %cst : f32 to vector<8x512xf32>
      %c0_11 = arith.constant 0 : index
      %c0_12 = arith.constant 0 : index
      %18 = vector.load %arg6[%c0_11, %c0_12] : memref<8x512xf32, #tpu.memory_space<vmem>>, vector<8x512xf32>
      tpu.vector_store %arg6[%c0_11, %c0_12], %17 {strides = array<i32>} : memref<8x512xf32, #tpu.memory_space<vmem>>, vector<8x512xf32>,
    } else {
    }
    %c0 = arith.constant 0 : index
    %c0_2 = arith.constant 0 : index
    %5 = vector.load %arg3[%c0, %c0_2] : memref<8x512xf32, #tpu.memory_space<vmem>>, vector<8x512xf32>
    %c0_3 = arith.constant 0 : index
    %c0_4 = arith.constant 0 : index
    %6 = vector.load %arg4[%c0_3, %c0_4] : memref<1x512xf32, #tpu.memory_space<vmem>>, vector<1x512xf32>
    %c0_5 = arith.constant 0 : index
    %c0_6 = arith.constant 0 : index
    %7 = vector.load %arg6[%c0_5, %c0_6] : memref<8x512xf32, #tpu.memory_space<vmem>>, vector<8x512xf32>
    %8 = vector.broadcast %6 : vector<1x512xf32> to vector<8x512xf32>
    %9 = arith.mulf %5, %8 : vector<8x512xf32>
    %10 = arith.addf %7, %9 : vector<8x512xf32>
    %c0_7 = arith.constant 0 : index
    %c0_8 = arith.constant 0 : index
    %11 = vector.load %arg6[%c0_7, %c0_8] : memref<8x512xf32, #tpu.memory_space<vmem>>, vector<8x512xf32>
    tpu.vector_store %arg6[%c0_7, %c0_8], %10 {strides = array<i32>} : memref<8x512xf32, #tpu.memory_space<vmem>>, vector<8x512xf32>,
    %c0_i32_9 = arith.constant 0 : i32
    %12 = arith.cmpi eq, %arg0, %c0_i32_9 : i32
    %c1_i32 = arith.constant 1 : i32
    %13 = arith.cmpi eq, %arg1, %c1_i32 : i32
    %14 = arith.andi %12, %13 : i1
    %15 = arith.extui %14 : i1 to i32
    %c0_i32_10 = arith.constant 0 : i32
    %16 = arith.cmpi ne, %15, %c0_i32_10 : i32
    scf.if %16 {
      %c0_11 = arith.constant 0 : index
      %c0_12 = arith.constant 0 : index
      %17 = vector.load %arg6[%c0_11, %c0_12] : memref<8x512xf32, #tpu.memory_space<vmem>>, vector<8x512xf32>
      %18 = vector.shape_cast %17 : vector<8x512xf32> to vector<1x8x512xf32>
      %cst = arith.constant dense<0.000000e+00> : vector<1xf32>
      %19 = vector.multi_reduction <add>, %18, %cst [1, 2] : vector<1x8x512xf32> to vector<1xf32>
      %20 = vector.shape_cast %19 : vector<1xf32> to vector<1x1x1xf32>
      %21 = vector.extract %20[0, 0, 0] : f32 from vector<1x1x1xf32>
      %c0_13 = arith.constant 0 : index
      %22 = memref.load %arg2[%c0_13] : memref<2xf32, #tpu.memory_space<smem>>
      %23 = arith.mulf %21, %22 : f32
      %c1 = arith.constant 1 : index
      %24 = memref.load %arg2[%c1] : memref<2xf32, #tpu.memory_space<smem>>
      %25 = arith.addf %23, %24 : f32
      %c0_14 = arith.constant 0 : index
      %c0_15 = arith.constant 0 : index
      %26 = memref.load %arg5[%c0_14, %c0_15] : memref<1x1xf32, #tpu.memory_space<smem>>
      memref.store %25, %arg5[%c0_14, %c0_15] : memref<1x1xf32, #tpu.memory_space<smem>>
    } else {
    }
    return
  }
  func.func @transform_0(%arg0: i32, %arg1: i32) -> i32 {
    %c0_i32 = arith.constant 0 : i32
    %c0_i32_0 = arith.constant 0 : i32
    return %c0_i32 : i32
  }
  func.func @transform_1(%arg0: i32, %arg1: i32) -> (i32, i32) {
    %c0_i32 = arith.constant 0 : i32
    return %arg0, %arg1 : i32, i32
  }
  func.func @transform_2(%arg0: i32, %arg1: i32) -> (i32, i32) {
    %c0_i32 = arith.constant 0 : i32
    %c0_i32_0 = arith.constant 0 : i32
    return %c0_i32, %arg1 : i32, i32
  }
  func.func @transform_3(%arg0: i32, %arg1: i32) -> (i32, i32) {
    %c0_i32 = arith.constant 0 : i32
    %c0_i32_0 = arith.constant 0 : i32
    %c0_i32_1 = arith.constant 0 : i32
    return %c0_i32, %c0_i32_0 : i32, i32
  }
}

</mosaic_0001>

<bundles_post_ra>
// kernel: tpu_custom_call.1
= control target key start
LH: loop header
LB: loop body
LE: loop exit
PB: predicated region body
PF: predicated region fallthrough
CT: control target
= control target key end

     0   :  { %8 = vsyncpa [#allocation5], 0  ;;  %s912_s0 = inlined_call_operand.hbm [shape: f32[2], index: 0, kind: input, shape index: {}]   ;;  %s913_s1 = inlined_call_operand.hbm [shape: f32[8,1024], index: 1, kind: input, shape index: {}]   ;;  %s914_s2 = inlined_call_operand.hbm [shape: f32[1,1024], index: 2, kind: input, shape index: {}]   ;;  %s915_s3 = inlined_call_operand.hbm [shape: f32[1,1], index: 3, kind: output, shape index: {}]  }
   0x1   :  { %9 = vsyncpa [#allocation4], 0 }
   0x2   :  { %11 = vsyncpa [#allocation4 + $0x1], 0 }
   0x3   :  { %12 = vsyncpa [#allocation9], 0 }
   0x4   :  { %14 = vsyncpa [#allocation9 + $0x1], 0 }
   0x5   :  { %15 = vsyncpa [#allocation6], 0  ;;  %s705_s12 = smov 0   ;;  %s707_s13 = smov 0  }
   0x6   :  { %s709_s14 = smov 0   ;;  %s711_s15 = smov 0  }
   0x7   :  { %s713_s16 = smov 0   ;;  %s715_s17 = smov 0  }
   0x8 LB: > { %s425_s18 = sadd.s32 4294967295, %s678_s17   ;;  %s63_s19 = sadd.s32 1, %s666_s14  ;;  %s678_s17 = sphi %s715_s17, %s21_s17   ;;  %s674_s16 = sphi %s713_s16, %s932_s16   ;;  %s670_s15 = sphi %s711_s15, %s931_s15   ;;  %s666_s14 = sphi %s709_s14, %s930_s14   ;;  %s662_s13 = sphi %s707_s13, %s929_s13   ;;  %s658_s12 = sphi %s705_s12, %s928_s12  }
   0x9   : > { %p70_p0 = scmp.ne.s32.totalorder %s666_s14, %s662_s13  ;;  %p76_p1 = scmp.ne.s32.totalorder %s662_s13, %s658_s12 }
   0xa   : > { %p740_p2 = scmp.eq.s32.totalorder %s425_s18, 0  ;;  %p426_p3 = scmp.ge.s32.totalorder %s678_s17, 1 }
   0xb   : > { %p134_p4 = scmp.lt.s32.totalorder %s678_s17, 3  ;;  %p71_p7 = scmp.eq.s32.totalorder %s678_s17, 0 }
   0xc   : > { %s920_s20 = scalar_select %p740_p2, 1, 0 }
   0xd   : > { %p748_p5 = por %p740_p2, %p76_p1  ;;  %p752_p6 = pnand %p426_p3, %p134_p4 }
   0xe   : > { %s30_s23 = sadd.s32 1, %s674_s16  ;;  %p760_p9 = por %p71_p7, %p70_p0 }
   0xf   : > { %s921_s21 = scalar_select %p748_p5, 1, 0 }
  0x10   : > { %s922_s22 = scalar_select %p752_p6, 1, 0 }
  0x11   : > { %p464_p8 = pneg %p752_p6  ;;  %p31_p11 = scmp.ge.s32.totalorder %s30_s23, 2 }
  0x12   : > { %p476_p12 = scmp.lt.s32.totalorder %s678_s17, 2  ;;  %s768_s25 = sand.u32 1, %s666_s14  }
  0x13   : > { %p465_p10 = pnand %p464_p8, %p740_p2  ;;  %s531_s28 = scalar_lea.hbm %s912_s0, 16 }
  0x14   : > { %p532_p13 = scmp.ne.s32.totalorder %s912_s0, %s531_s28  ;;  %p538_p4 = scmp.lt.u32.totalorder %s531_s28, %s912_s0 }
  0x15   : > { %p533_p1 = pneg %p465_p10 }
  0x17   : > { %p534_p3 = pnand %p533_p1, %p532_p13 }
  0x19   : > { %p535_p0 = pneg %p534_p3 }
  0x1b   : > { %p540_p7 = pnand %p538_p4, %p535_p0 }
  0x1d   : > { %543 = shalt.err (!%p540_p7)
}
  0x1e   : > { %s680_s6 = smov [#allocation3]   ;;  %s934_s23 = smov (%p31_p11, %s30_s23), 0 }
  0x1f   : > { %467 = dma.hbm_to_smem (!%p465_p10), %s912_s0, 16, %s680_s6, [#allocation5]  }
  0x20   : > { %s429_s9 = sshll.u32 %s768_s25, 5  ;;  %s446_s10 = sshll.u32 %s674_s16, 9 }
  0x21   : > { %s59_s11 = ssub.s32 %s674_s16, %s934_s23  ;;  %s791_s27 = scalar_lea.hbm %s913_s1, %s446_s10 }
  0x22   : > { %p61_p8 = scmp.eq.s32.totalorder %s59_s11, 0  ;;  %s160_s28 = scalar_lea.vmem [#allocation7], %s429_s9 }
  0x23   : > { %s170_s29 = sshll.u32 %s160_s28, 4  ;;  %p797_p10 = pnand %p476_p12, %p760_p9  ;;  %s806_s29 = int_to_ptr.vmem [resolvable:$true] %s170_s29 }
  0x24   : > { %s804_s4 = scalar_select %p61_p8, %s666_s14, %s63_s19  }
  0x25   : > { %s157_s5 = scalar_lea.sflag [#allocation4], %s768_s25  ;;  %s544_s6 = scalar_lea.hbm %s791_s27, 512 }
  0x26   : > { %p545_p11 = scmp.ne.s32.totalorder %s791_s27, %s544_s6  ;;  %p546_p13 = pneg %p797_p10 }
  0x27   : > { %s549_s8 = scalar_lea.hbm %s913_s1, 1024  ;;  %p550_p9 = scmp.lt.u32.totalorder %s791_s27, %s913_s1 }
  0x28   : > { %p547_p1 = pnand %p546_p13, %p545_p11  ;;  %p551_p12 = scmp.lt.u32.totalorder %s549_s8, %s544_s6 }
  0x29   : > { %p553_p4 = scmp.lt.u32.totalorder %s544_s6, %s791_s27 }
  0x2a   : > { %p548_p3 = pneg %p547_p1  ;;  %p552_p0 = por %p551_p12, %p550_p9 }
  0x2c   : > { %p554_p7 = por %p553_p4, %p552_p0 }
  0x2e   : > { %p555_p8 = pnand %p554_p7, %p548_p3 }
  0x30   : > { %558 = shalt.err (!%p555_p8)
}
  0x31   : > { %s559_s19 = scalar_lea.vmem %s806_s29, 512  ;;  %s681_s11 = smov [#allocation7]  }
  0x32   : > { %p560_p11 = scmp.ne.s32.totalorder %s806_s29, %s559_s19  ;;  %s564_s12 = sshll.u32 %s681_s11, 4  ;;  %s565_s12 = int_to_ptr.vmem [resolvable:$false] %s564_s12 }
  0x33   : > { %s566_s26 = scalar_lea.vmem %s565_s12, 1024  ;;  %p567_p2 = scmp.lt.s32.totalorder %s806_s29, %s565_s12 }
  0x34   : > { %p562_p1 = pnand %p560_p11, %p546_p13  ;;  %p568_p9 = scmp.lt.s32.totalorder %s566_s26, %s559_s19 }
  0x36   : > { %p563_p5 = pneg %p562_p1  ;;  %p569_p12 = por %p568_p9, %p567_p2 }
  0x38   : > { %p570_p0 = pnand %p569_p12, %p563_p5 }
  0x3a   : > { %573 = shalt.err (!%p570_p0)
}
  0x3b   : > { %471 = dma.hbm_to_vmem [thread:$0]  (!%p797_p10), %s791_s27, 512, %s806_s29, %s157_s5  }
  0x3c   : > { %s432_s28 = sshll.u32 %s768_s25, 2  ;;  %s447_s6 = sshll.u32 %s674_s16, 6 }
  0x3d   : > { %s839_s8 = scalar_lea.hbm %s914_s2, %s447_s6  ;;  %s181_s9 = scalar_lea.vmem [#allocation8], %s432_s28 }
  0x3e   : > { %s189_s10 = sshll.u32 %s181_s9, 4  ;;  %s178_s19 = scalar_lea.sflag [#allocation9], %s768_s25  ;;  %s190_s10 = int_to_ptr.vmem [resolvable:$true] %s189_s10 }
  0x3f   : > { %s574_s11 = scalar_lea.hbm %s839_s8, 64  ;;  %s579_s5 = scalar_lea.hbm %s914_s2, 128 }
  0x40   : > { %p575_p2 = scmp.ne.s32.totalorder %s839_s8, %s574_s11  ;;  %p580_p4 = scmp.lt.u32.totalorder %s839_s8, %s914_s2 }
  0x41   : > { %p581_p7 = scmp.lt.u32.totalorder %s579_s5, %s574_s11  ;;  %p583_p11 = scmp.lt.u32.totalorder %s574_s11, %s839_s8 }
  0x42   : > { %p577_p5 = pnand %p575_p2, %p546_p13 }
  0x43   : > { %p582_p8 = por %p581_p7, %p580_p4 }
  0x44   : > { %p578_p3 = pneg %p577_p5 }
  0x45   : > { %p584_p1 = por %p583_p11, %p582_p8 }
  0x47   : > { %p585_p9 = pnand %p584_p1, %p578_p3 }
  0x49   : > { %588 = shalt.err (!%p585_p9)
}
  0x4a   : > { %s589_s25 = scalar_lea.vmem %s190_s10, 64  ;;  %s682_s28 = smov [#allocation8]  }
  0x4b   : > { %p590_p12 = scmp.ne.s32.totalorder %s190_s10, %s589_s25  ;;  %s594_s6 = sshll.u32 %s682_s28, 4  ;;  %s595_s6 = int_to_ptr.vmem [resolvable:$false] %s594_s6 }
  0x4c   : > { %s596_s24 = scalar_lea.vmem %s595_s6, 128  ;;  %p597_p5 = scmp.lt.s32.totalorder %s190_s10, %s595_s6 }
  0x4d   : > { %p592_p0 = pnand %p590_p12, %p546_p13  ;;  %p598_p6 = scmp.lt.s32.totalorder %s596_s24, %s589_s25 }
  0x4f   : > { %p593_p2 = pneg %p592_p0  ;;  %p599_p4 = por %p598_p6, %p597_p5 }
  0x51   : > { %p600_p7 = pnand %p599_p4, %p593_p2 }
  0x53   : > { %603 = shalt.err (!%p600_p7)
}
  0x54   : > { %474 = dma.hbm_to_vmem [thread:$0]  (!%p797_p10), %s839_s8, 64, %s190_s10, %s178_s19  }
  0x55   : > { %p925_p3 = scmp.ne.s32.totalorder %s922_s22, 0 }
  0x56   : > { %p926_p8 = scmp.ne.s32.totalorder (!%p925_p3), %s920_s20, 0 }
  0x57   : > { %198 = sbr.rel (%p925_p3) target bundleno = 363 (0x16b), region = 32 }
  0x5e   : > { %641 = dma.done.wait (%p926_p8), [#allocation5], 16  }
  0x5f   : > { %643 = vsyncadd (%p926_p8), [#allocation5], 4294967280  ;;  %s204_s7 = sand.u32 1, %s662_s13   ;;  %p927_p6 = scmp.ne.s32.totalorder %s921_s21, 0 }
  0x60   : > { %s437_s9 = sshll.u32 %s204_s7, 5  ;;  %s205_s11 = scalar_lea.sflag [#allocation4], %s204_s7 }
  0x61   : > { %s208_s27 = scalar_lea.vmem [#allocation7], %s437_s9 }
  0x62   : > { %645 = dma.done.wait (%p927_p6), %s205_s11, 512  }
  0x63   : > { %647 = vsyncadd (%p927_p6), %s205_s11, 4294966784  ;;  %s438_s22 = sshll.u32 %s204_s7, 2  ;;  %s214_s30 = scalar_lea.sflag [#allocation9], %s204_s7 }
  0x64   : > { %s217_s8 = scalar_lea.vmem [#allocation8], %s438_s22 }
  0x65   : > { %649 = dma.done.wait (%p927_p6), %s214_s30, 64  }
  0x66   : > { %651 = vsyncadd (%p927_p6), %s214_s30, 4294967232 }
  0x67   : > { %222 = sfence }
  0x68   : > { %p244_p10 = scmp.eq.s32.totalorder %s670_s15, 0 }
  0x69   : > { %v683_v0 = vmov (%p244_p10), 0.0  }
  0x6a   : > { %248 = sbr.rel (!%p244_p10) target bundleno = 113 (0x71), region = 48  ;;  %249 = vst [vmem:[#allocation2] sm:$0xff] (%p244_p10), %v683_v0  ;;  %250 = vst [vmem:[#allocation2 + $0x8] sm:$0xff] (%p244_p10), %v683_v0 }
  0x6b   : > { %251 = vst [vmem:[#allocation2 + $0x10] sm:$0xff] (%p244_p10), %v683_v0  ;;  %252 = vst [vmem:[#allocation2 + $0x18] sm:$0xff] (%p244_p10), %v683_v0 }
  0x71 PF: > { %v263_v1 = vlaneseq  ;;  %p295_p13 = scmp.eq.s32.totalorder %s670_s15, 1  ;;  %v257_v3 = vld [vmem:[%s217_s8] sm:$0xf]  ;;  %v254_v9 = vld [vmem:[%s208_s27 + $0x8] sm:$0xff]  ;;  %v255_v10 = vld [vmem:[%s208_s27 + $0x10] sm:$0xff] }
  0x72   : > { %v253_v4 = vld [vmem:[%s208_s27] sm:$0xff]  ;;  %v256_v11 = vld [vmem:[%s208_s27 + $0x18] sm:$0xff]  ;;  %v259_v17 = vld [vmem:[#allocation2 + $0x8] sm:$0xff]  ;;  %s316_s20 = sld [smem:[#allocation3]] (%p295_p13)  ;;  %s441_s21 = sld [smem:[#allocation3 + $0x1]] (%p295_p13) }
  0x73   : > { %v264_v2 = vshrl.u32 %v263_v1, 7  ;;  %v258_v12 = vld [vmem:[#allocation2] sm:$0xff]  ;;  %v260_v18 = vld [vmem:[#allocation2 + $0x10] sm:$0xff]  ;;  %v261_v19 = vld [vmem:[#allocation2 + $0x18] sm:$0xff] }
  0x75   : > { %v265_v5 = vsub.s32 0, %v264_v2  ;;  %v269_v6 = vsub.s32 1, %v264_v2  ;;  %v273_v7 = vsub.s32 2, %v264_v2  ;;  %v277_v8 = vsub.s32 3, %v264_v2 }
  0x77   : > { %v266_v13 = vrot.slane %v257_v3, %v265_v5  ;;  %v270_v14 = vrot.slane %v257_v3, %v269_v6  ;;  %v274_v15 = vrot.slane %v257_v3, %v273_v7  ;;  %v278_v16 = vrot.slane %v257_v3, %v277_v8 }
  0x78   : > { %299 = sbr.rel (!%p295_p13) target bundleno = 348 (0x15c), region = 52 }
  0x79   : > { %v283_v20 = vmul.f32 %v266_v13, %v253_v4  ;;  %v284_v21 = vmul.f32 %v270_v14, %v254_v9  ;;  %v285_v22 = vmul.f32 %v274_v15, %v255_v10  ;;  %v286_v23 = vmul.f32 %v278_v16, %v256_v11 }
  0x7b   : > { %v287_v24 = vadd.f32 %v283_v20, %v258_v12  ;;  %v288_v25 = vadd.f32 %v284_v21, %v259_v17  ;;  %v289_v26 = vadd.f32 %v285_v22, %v260_v18  ;;  %v290_v27 = vadd.f32 %v286_v23, %v261_v19 }
  0x7d   : > { %291 = vst [vmem:[#allocation2] sm:$0xff] %v287_v24  ;;  %292 = vst [vmem:[#allocation2 + $0x8] sm:$0xff] %v288_v25 }
  0x7e   : > { %293 = vst [vmem:[#allocation2 + $0x10] sm:$0xff] %v289_v26  ;;  %294 = vst [vmem:[#allocation2 + $0x18] sm:$0xff] %v290_v27 }
  0x84   : > { %v300_v28 = vld [vmem:[#allocation2] sm:$0xff]  ;;  %v301_v29 = vld [vmem:[#allocation2 + $0x8] sm:$0xff] }
  0x85   : > { %v302_v30 = vld [vmem:[#allocation2 + $0x10] sm:$0xff]  ;;  %v304_v31 = vadd.f32 %v301_v29, %v300_v28  ;;  %v303_v32 = vld [vmem:[#allocation2 + $0x18] sm:$0xff] }
  0x87   : > { %v305_v33 = vadd.f32 %v304_v31, %v302_v30 }
  0x89   : > { %v306_v34 = vadd.f32 %v305_v33, %v303_v32 }
  0x8b   : > { %307 = vadd.xlane.f32.xlu0 %v306_v34 }
 0x118   : > { %v308_v35 = vpop.xlane.xlu0 %307 }
 0x119   : > { %v309_v36 = vrot.slane %v308_v35, 4 }
 0x11b   : > { %v310_v37 = vadd.f32 %v309_v36, %v308_v35 }
 0x11d   : > { %v311_v38 = vrot.slane %v310_v37, 2 }
 0x11f   : > { %v312_v39 = vadd.f32 %v311_v38, %v310_v37 }
 0x121   : > { %v313_v40 = vrot.slane %v312_v39, 1 }
 0x123   : > { %v314_v41 = vadd.f32 %v313_v40, %v312_v39 }
 0x125   : > { %450 = vpush %v314_v41 }
 0x156   : > { %s451_s15 = spop %450 }
 0x157   : > { %s317_s10 = smul.f32 %s451_s15, %s316_s20 }
 0x159   : > { %s319_s19 = sadd.f32 %s441_s21, %s317_s10 }
 0x15b   : > { %321 = sst [smem:[#allocation10]] %s319_s19 }
 0x15c PF: > { %p478_p11 = scmp.eq.s32.totalorder %s425_s18, 1  ;;  %s604_s12 = scalar_lea.hbm %s915_s3, 16 }
 0x15d   : > { %p605_p1 = scmp.ne.s32.totalorder %s915_s3, %s604_s12  ;;  %p610_p0 = scmp.lt.u32.totalorder %s604_s12, %s915_s3 }
 0x15f   : > { %p606_p9 = pnand %p605_p1, %p478_p11 }
 0x161   : > { %p607_p12 = pneg %p606_p9 }
 0x163   : > { %p612_p2 = pnand %p610_p0, %p607_p12 }
 0x165   : > { %615 = shalt.err (!%p612_p2)
}
 0x166   : > { %s684_s24 = smov [#allocation10]  }
 0x167   : > { %461 = dma.smem_to_hbm (%p478_p11), %s684_s24, 16, %s915_s3, [#allocation6]  }
 0x168   : > { %653 = dma.done.wait (%p478_p11), [#allocation6], 16  }
 0x169   : > { %655 = vsyncadd (%p478_p11), [#allocation6], 4294967280 }
 0x16a   : > { %335 = sfence }
 0x16b PF: > { %s21_s17 = sadd.s32 1, %s678_s17   ;;  %s928_s12 = smov %s662_s13 }
 0x16c   : > { %p18_p5 = scmp.ge.s32.totalorder %s21_s17, 4   ;;  %s929_s13 = smov %s666_s14 }
 0x16d   : > { %s930_s14 = smov %s804_s4  ;;  %s931_s15 = smov %s674_s16 }
 0x16e   : > { %s932_s16 = smov %s934_s23  ;;  %20 = sbr.rel (!%p18_p5) target bundleno = 8 (0x8), region = 96 }
 0x175   :  { %341 = vsyncpa [#allocation4], 1 }
 0x176   :  { %343 = vsyncpa [#allocation4 + $0x1], 1 }
 0x177   :  { %344 = vsyncpa [#allocation9], 1 }
 0x178   :  { %346 = vsyncpa [#allocation9 + $0x1], 1 }
 0x179   :  { %347 = vsyncpa [#allocation5], 1 }
 0x17a   :  { %349 = vsyncpa [#allocation5 + $0x1], 1 }
 0x17b   :  { %350 = vsyncpa [#allocation6], 1 }
 0x17c   :  { %352 = vsyncpa [#allocation6 + $0x1], 1 }

</bundles_post_ra>
